<compile_context>
chip_gen: v6e
topology: v6e:2x2x1
jax: 0.10.0
libtpu: 0.0.40
codegen_flags: <defaults>
</compile_context>

<pallas_src>
import jax
import jax.numpy as jnp
from jax.experimental import pallas as pl
from jax.experimental.pallas import tpu as pltpu


def _round_up(x, m):
    return ((x + m - 1) // m) * m


def _actor_kernel(x_ref, w1_ref, b1_ref, w2_ref, b2_ref, w3_ref, b3_ref, o_ref):
    # Transposed problem: columns = batch (lanes), rows = features (sublanes).
    x = x_ref[...]                                               # (S, TB) f32
    # fc1 + relu : (H, S) @ (S, TB) -> (H, TB)
    h1 = jnp.dot(w1_ref[...], x, preferred_element_type=jnp.float32)
    h1 = jnp.maximum(h1 + b1_ref[...], 0.0)
    # fc2 + relu : (H, H) @ (H, TB) -> (H, TB)
    h2 = jnp.dot(w2_ref[...], h1, preferred_element_type=jnp.float32)
    h2 = jnp.maximum(h2 + b2_ref[...], 0.0)
    # fc3 : (O, H) @ (H, TB) -> (O, TB)
    logits = jnp.dot(w3_ref[...], h2, preferred_element_type=jnp.float32)
    logits = logits + b3_ref[...]
    # softmax over the feature axis (axis=0 in transposed layout), numerically
    # stable, exact normalization (rows of the un-transposed output sum to 1).
    m = jnp.max(logits, axis=0, keepdims=True)
    e = jnp.exp(logits - m)
    denom = jnp.sum(e, axis=0, keepdims=True)
    o_ref[...] = (e / denom).astype(o_ref.dtype)


def _vmem_budget(tb, state_dim, hidden, out_dim):
    """Size vmem_limit_bytes from the actual resident f32 buffers."""
    def tile_bytes(rows, cols):
        return _round_up(max(rows, 1), 8) * _round_up(max(cols, 1), 128) * 4

    weights = (tile_bytes(hidden, state_dim) + tile_bytes(hidden, hidden)
               + tile_bytes(out_dim, hidden)
               + 2 * tile_bytes(hidden, 1) + tile_bytes(out_dim, 1))
    io = tile_bytes(state_dim, tb) + tile_bytes(out_dim, tb)
    inter = 2 * tile_bytes(hidden, tb) + 2 * tile_bytes(out_dim, tb)
    # 2x for double buffering + headroom; clamp below the v7x 64 MiB physical
    # VMEM so the compiler keeps scratch room.
    total = 2 * (weights + io + inter) + (4 << 20)
    return int(min(max(total, 8 << 20), 48 << 20))


@jax.jit
def actor_forward(state, w1, b1, w2, b2, w3, b3):
    B, state_dim = state.shape
    hidden = w1.shape[1]
    out_dim = w3.shape[1]

    # Batch maps to the lane axis -> batch tile must be a multiple of 128.
    # 1 grid step for small B (v5e/v6e: grid steps are a serial loop);
    # 2 balanced steps once B >= 256 so both v7x TensorCores get work.
    n_tiles = 2 if B >= 256 else 1
    TB = _round_up(pl.cdiv(B, n_tiles), 128)
    B_pad = TB * n_tiles

    # Transposed operands: x^T (S, B), W^T (out, in), biases as columns.
    x_t = state.T
    if B_pad != B:
        x_t = jnp.pad(x_t, ((0, 0), (0, B_pad - B)))
    w1t, w2t, w3t = w1.T, w2.T, w3.T
    b1c = b1.reshape(hidden, 1)
    b2c = b2.reshape(hidden, 1)
    b3c = b3.reshape(out_dim, 1)

    # Weights/biases: same block every grid step -> resident in VMEM.
    resident = lambda a: pl.BlockSpec(a.shape, lambda i: (0,) * a.ndim)

    out_t = pl.pallas_call(
        _actor_kernel,
        out_shape=jax.ShapeDtypeStruct((out_dim, B_pad), jnp.float32),
        grid=(n_tiles,),
        in_specs=[pl.BlockSpec((state_dim, TB), lambda i: (0, i)),
                  resident(w1t), resident(b1c),
                  resident(w2t), resident(b2c),
                  resident(w3t), resident(b3c)],
        out_specs=pl.BlockSpec((out_dim, TB), lambda i: (0, i)),
        compiler_params=pltpu.CompilerParams(
            dimension_semantics=("parallel",),
            vmem_limit_bytes=_vmem_budget(TB, state_dim, hidden, out_dim)),
    )(x_t, w1t, b1c, w2t, b2c, w3t, b3c)

    return out_t.T[:B]


def init_actor_params(key, state_dim, hidden_size, output_size):
    """PyTorch-style init: U(-1/sqrt(fan_in), 1/sqrt(fan_in)).

    Weights stored as [in_dim, out_dim] (transposed vs torch.nn.Linear),
    biases as [1, out_dim].
    """
    ks = jax.random.split(key, 6)

    def lin(kw, kb, fan_in, fan_out):
        bound = 1.0 / jnp.sqrt(jnp.array(fan_in, jnp.float32))
        w = jax.random.uniform(kw, (fan_in, fan_out), jnp.float32, -bound, bound)
        b = jax.random.uniform(kb, (1, fan_out), jnp.float32, -bound, bound)
        return w, b

    w1, b1 = lin(ks[0], ks[1], state_dim, hidden_size)
    w2, b2 = lin(ks[2], ks[3], hidden_size, hidden_size)
    w3, b3 = lin(ks[4], ks[5], hidden_size, output_size)
    return w1, b1, w2, b2, w3, b3


def actor_reference(state, w1, b1, w2, b2, w3, b3):
    h1 = jnp.maximum(state @ w1 + b1, 0.0)
    h2 = jnp.maximum(h1 @ w2 + b2, 0.0)
    logits = h2 @ w3 + b3
    return jax.nn.softmax(logits, axis=1)


if __name__ == "__main__":
    key = jax.random.PRNGKey(0)
    state_dim, hidden, out_dim = 16, 32, 4
    k_x, k_p, k_x2 = jax.random.split(key, 3)
    params = init_actor_params(k_p, state_dim, hidden, out_dim)

    # Small batch: single grid step, batch padded to one 128-lane tile.
    B = 8
    state = jax.random.normal(k_x, (B, state_dim), jnp.float32)
    out = jax.block_until_ready(actor_forward(state, *params))
    ref = actor_reference(state, *params)
    assert out.shape == (B, out_dim)
    assert jnp.allclose(out, ref, atol=1e-3, rtol=1e-3), "mismatch vs reference (small batch)"
    assert jnp.allclose(jnp.sum(out, axis=1), 1.0, atol=1e-4), "softmax rows must sum to 1"

    # Larger batch: 2 balanced 384-lane tiles (600 -> 768), sharded across
    # TensorCores on v7x via dimension_semantics=("parallel",).
    B2 = 600
    state2 = jax.random.normal(k_x2, (B2, state_dim), jnp.float32)
    out2 = jax.block_until_ready(actor_forward(state2, *params))
    ref2 = actor_reference(state2, *params)
    assert out2.shape == (B2, out_dim)
    assert jnp.allclose(out2, ref2, atol=1e-3, rtol=1e-3), "mismatch vs reference (large batch)"
    assert jnp.allclose(jnp.sum(out2, axis=1), 1.0, atol=1e-4), "softmax rows must sum to 1"

    print("KERNEL_OK")
</pallas_src>

<mosaic_0001>
module attributes {stable_mosaic.version = 11 : i64} {
  func.func @_actor_kernel(%arg0: i32, %arg1: memref<16x128xf32, #tpu.memory_space<vmem>>, %arg2: memref<32x16xf32, #tpu.memory_space<vmem>>, %arg3: memref<32x1xf32, #tpu.memory_space<vmem>>, %arg4: memref<32x32xf32, #tpu.memory_space<vmem>>, %arg5: memref<32x1xf32, #tpu.memory_space<vmem>>, %arg6: memref<4x32xf32, #tpu.memory_space<vmem>>, %arg7: memref<4x1xf32, #tpu.memory_space<vmem>>, %arg8: memref<4x128xf32, #tpu.memory_space<vmem>>) attributes {dimension_semantics = [#tpu.dimension_semantics<parallel>], iteration_bounds = array<i64: 1>, scalar_prefetch = 0 : i64, scratch_operands = 0 : i64, tpu.core_type = #tpu.core_type<tc>, window_params = [{transform_indices = @transform_0, window_bounds = array<i64: 16, 128>}, {pipeline_mode = #tpu.pipeline_mode<synchronous>, transform_indices = @transform_1, window_bounds = array<i64: 32, 16>}, {pipeline_mode = #tpu.pipeline_mode<synchronous>, transform_indices = @transform_2, window_bounds = array<i64: 32, 1>}, {pipeline_mode = #tpu.pipeline_mode<synchronous>, transform_indices = @transform_3, window_bounds = array<i64: 32, 32>}, {pipeline_mode = #tpu.pipeline_mode<synchronous>, transform_indices = @transform_4, window_bounds = array<i64: 32, 1>}, {pipeline_mode = #tpu.pipeline_mode<synchronous>, transform_indices = @transform_5, window_bounds = array<i64: 4, 32>}, {pipeline_mode = #tpu.pipeline_mode<synchronous>, transform_indices = @transform_6, window_bounds = array<i64: 4, 1>}, {transform_indices = @transform_7, window_bounds = array<i64: 4, 128>}]} {
    %c0 = arith.constant 0 : index
    %c0_0 = arith.constant 0 : index
    %0 = vector.load %arg1[%c0, %c0_0] : memref<16x128xf32, #tpu.memory_space<vmem>>, vector<16x128xf32>
    %c0_1 = arith.constant 0 : index
    %c0_2 = arith.constant 0 : index
    %1 = vector.load %arg2[%c0_1, %c0_2] : memref<32x16xf32, #tpu.memory_space<vmem>>, vector<32x16xf32>
    %cst = arith.constant dense<0.000000e+00> : vector<32x128xf32>
    %2 = tpu.matmul %1, %0, %cst {dimension_numbers = #tpu.dot_dimension_numbers<[1], [0], [0], [1], [0, 0, 1, 1], [], []>} : vector<32x16xf32>, vector<16x128xf32>, vector<32x128xf32> -> vector<32x128xf32>
    %c0_3 = arith.constant 0 : index
    %c0_4 = arith.constant 0 : index
    %3 = vector.load %arg3[%c0_3, %c0_4] : memref<32x1xf32, #tpu.memory_space<vmem>>, vector<32x1xf32>
    %4 = vector.broadcast %3 : vector<32x1xf32> to vector<32x128xf32>
    %5 = arith.addf %2, %4 : vector<32x128xf32>
    %cst_5 = arith.constant 0.000000e+00 : f32
    %6 = vector.broadcast %cst_5 : f32 to vector<32x128xf32>
    %7 = arith.maximumf %5, %6 : vector<32x128xf32>
    %c0_6 = arith.constant 0 : index
    %c0_7 = arith.constant 0 : index
    %8 = vector.load %arg4[%c0_6, %c0_7] : memref<32x32xf32, #tpu.memory_space<vmem>>, vector<32x32xf32>
    %cst_8 = arith.constant dense<0.000000e+00> : vector<32x128xf32>
    %9 = tpu.matmul %8, %7, %cst_8 {dimension_numbers = #tpu.dot_dimension_numbers<[1], [0], [0], [1], [0, 0, 1, 1], [], []>} : vector<32x32xf32>, vector<32x128xf32>, vector<32x128xf32> -> vector<32x128xf32>
    %c0_9 = arith.constant 0 : index
    %c0_10 = arith.constant 0 : index
    %10 = vector.load %arg5[%c0_9, %c0_10] : memref<32x1xf32, #tpu.memory_space<vmem>>, vector<32x1xf32>
    %11 = vector.broadcast %10 : vector<32x1xf32> to vector<32x128xf32>
    %12 = arith.addf %9, %11 : vector<32x128xf32>
    %cst_11 = arith.constant 0.000000e+00 : f32
    %13 = vector.broadcast %cst_11 : f32 to vector<32x128xf32>
    %14 = arith.maximumf %12, %13 : vector<32x128xf32>
    %c0_12 = arith.constant 0 : index
    %c0_13 = arith.constant 0 : index
    %15 = vector.load %arg6[%c0_12, %c0_13] : memref<4x32xf32, #tpu.memory_space<vmem>>, vector<4x32xf32>
    %cst_14 = arith.constant dense<0.000000e+00> : vector<4x128xf32>
    %16 = tpu.matmul %15, %14, %cst_14 {dimension_numbers = #tpu.dot_dimension_numbers<[1], [0], [0], [1], [0, 0, 1, 1], [], []>} : vector<4x32xf32>, vector<32x128xf32>, vector<4x128xf32> -> vector<4x128xf32>
    %c0_15 = arith.constant 0 : index
    %c0_16 = arith.constant 0 : index
    %17 = vector.load %arg7[%c0_15, %c0_16] : memref<4x1xf32, #tpu.memory_space<vmem>>, vector<4x1xf32>
    %18 = vector.broadcast %17 : vector<4x1xf32> to vector<4x128xf32>
    %19 = arith.addf %16, %18 : vector<4x128xf32>
    %cst_17 = arith.constant dense<0xFF800000> : vector<128xf32>
    %20 = vector.multi_reduction <maximumf>, %19, %cst_17 [0] : vector<4x128xf32> to vector<128xf32>
    %21 = vector.shape_cast %20 : vector<128xf32> to vector<1x128xf32>
    %22 = vector.broadcast %21 : vector<1x128xf32> to vector<4x128xf32>
    %23 = arith.subf %19, %22 : vector<4x128xf32>
    %24 = math.exp %23 : vector<4x128xf32>
    %cst_18 = arith.constant dense<0.000000e+00> : vector<128xf32>
    %25 = vector.multi_reduction <add>, %24, %cst_18 [0] : vector<4x128xf32> to vector<128xf32>
    %26 = vector.shape_cast %25 : vector<128xf32> to vector<1x128xf32>
    %27 = vector.broadcast %26 : vector<1x128xf32> to vector<4x128xf32>
    %28 = arith.divf %24, %27 : vector<4x128xf32>
    %c0_19 = arith.constant 0 : index
    %c0_20 = arith.constant 0 : index
    %29 = vector.load %arg8[%c0_19, %c0_20] : memref<4x128xf32, #tpu.memory_space<vmem>>, vector<4x128xf32>
    tpu.vector_store %arg8[%c0_19, %c0_20], %28 {strides = array<i32>} : memref<4x128xf32, #tpu.memory_space<vmem>>, vector<4x128xf32>,
    return
  }
  func.func @transform_0(%arg0: i32) -> (i32, i32) {
    %c0_i32 = arith.constant 0 : i32
    %c0_i32_0 = arith.constant 0 : i32
    return %c0_i32, %arg0 : i32, i32
  }
  func.func @transform_1(%arg0: i32) -> (i32, i32) {
    %c0_i32 = arith.constant 0 : i32
    %c0_i32_0 = arith.constant 0 : i32
    %c0_i32_1 = arith.constant 0 : i32
    return %c0_i32, %c0_i32_0 : i32, i32
  }
  func.func @transform_2(%arg0: i32) -> (i32, i32) {
    %c0_i32 = arith.constant 0 : i32
    %c0_i32_0 = arith.constant 0 : i32
    %c0_i32_1 = arith.constant 0 : i32
    return %c0_i32, %c0_i32_0 : i32, i32
  }
  func.func @transform_3(%arg0: i32) -> (i32, i32) {
    %c0_i32 = arith.constant 0 : i32
    %c0_i32_0 = arith.constant 0 : i32
    %c0_i32_1 = arith.constant 0 : i32
    return %c0_i32, %c0_i32_0 : i32, i32
  }
  func.func @transform_4(%arg0: i32) -> (i32, i32) {
    %c0_i32 = arith.constant 0 : i32
    %c0_i32_0 = arith.constant 0 : i32
    %c0_i32_1 = arith.constant 0 : i32
    return %c0_i32, %c0_i32_0 : i32, i32
  }
  func.func @transform_5(%arg0: i32) -> (i32, i32) {
    %c0_i32 = arith.constant 0 : i32
    %c0_i32_0 = arith.constant 0 : i32
    %c0_i32_1 = arith.constant 0 : i32
    return %c0_i32, %c0_i32_0 : i32, i32
  }
  func.func @transform_6(%arg0: i32) -> (i32, i32) {
    %c0_i32 = arith.constant 0 : i32
    %c0_i32_0 = arith.constant 0 : i32
    %c0_i32_1 = arith.constant 0 : i32
    return %c0_i32, %c0_i32_0 : i32, i32
  }
  func.func @transform_7(%arg0: i32) -> (i32, i32) {
    %c0_i32 = arith.constant 0 : i32
    %c0_i32_0 = arith.constant 0 : i32
    return %c0_i32, %arg0 : i32, i32
  }
}

</mosaic_0001>

<bundles_post_ra>
// kernel: actor_forward.1
= control target key start
LH: loop header
LB: loop body
LE: loop exit
PB: predicated region body
PF: predicated region fallthrough
CT: control target
= control target key end

     0   :  { %vm57_vm0 = vcmask 130048   ;;  %v499_v4 = vmov 0   ;;  %s615_s0 = inlined_call_operand.vmem [shape: f32[16,128], index: 0, kind: input, shape index: {}]   ;;  %s616_s1 = inlined_call_operand.vmem [shape: f32[32,16], index: 1, kind: input, shape index: {}]   ;;  %s617_s2 = inlined_call_operand.vmem [shape: f32[32,1], index: 2, kind: input, shape index: {}]   ;;  %s618_s3 = inlined_call_operand.vmem [shape: f32[32,32], index: 3, kind: input, shape index: {}]   ;;  %s619_s4 = inlined_call_operand.vmem [shape: f32[32,1], index: 4, kind: input, shape index: {}]   ;;  %s620_s5 = inlined_call_operand.vmem [shape: f32[4,32], index: 5, kind: input, shape index: {}]   ;;  %s621_s6 = inlined_call_operand.vmem [shape: f32[4,1], index: 6, kind: input, shape index: {}]   ;;  %s622_s7 = inlined_call_operand.hbm [shape: f32[4,128], index: 7, kind: output, shape index: {}]  }
   0x1   :  { %v28_v0 = vld [vmem:[%s615_s0 + $0x8] sm:$0xff]  ;;  %v27_v1 = vld [vmem:[%s615_s0] sm:$0xff]  ;;  %471 = vset.pattern.permute.xlu0 %v499_v4  ;;  %v36_v5 = vld [vmem:[%s617_s2 + $0x18] sm:$0xff]  ;;  %472 = vset.pattern.permute.xlu1 %v499_v4 }
   0x2   :  { %v29_v2 = vld [vmem:[%s616_s1] sm:$0xff]  ;;  %432 = vmatprep.subr.mxu0 %v28_v0  ;;  %v30_v3 = vld [vmem:[%s616_s1 + $0x8] sm:$0xff]  ;;  %v31_v6 = vld [vmem:[%s616_s1 + $0x10] sm:$0xff]  ;;  %54 = vperm.xlu0 %471, %v36_v5  }
   0x3   :  { %436 = vmatprep.mubr.msk.f32.mxu0 %vm57_vm0, %v29_v2  ;;  %433 = vmatpush3.msra.mxu0 %v28_v0  ;;  %v34_v7 = vld [vmem:[%s617_s2 + $0x8] sm:$0xff]  ;;  %v35_v8 = vld [vmem:[%s617_s2 + $0x10] sm:$0xff] }
   0x4   :  { %434 = vmatprep.subr.mxu0 %v27_v1  ;;  %44 = vperm.xlu1 %472, %v34_v7  }
   0x5   :  { %435 = vmatpush3.msra.mxu0 %v27_v1 }
   0x6   :  { %437 = vmatmul.mubr.msk.f32.vlgmr.msra.gmra.mxu0 %vm57_vm0, %v30_v3 }
   0x7   :  { %12 = vsyncpa [#allocation3], 0  ;;  %439 = vmatprep.mubr.msk.f32.mxu0 %vm57_vm0, %v31_v6  ;;  %v32_v9 = vld [vmem:[%s616_s1 + $0x18] sm:$0xff]  ;;  %v33_v10 = vld [vmem:[%s617_s2] sm:$0xff]  ;;  %49 = vperm.xlu0 %471, %v35_v8   ;;  %vm187_vm1 = vcmask 261120   ;;  %v500_v36 = vmov 0.0  }
   0x8   :  { %v166_v11 = vld [vmem:[%s619_s4 + $0x18] sm:$0xff]  ;;  %39 = vperm.xlu1 %472, %v33_v10   ;;  %v165_v12 = vld [vmem:[%s619_s4 + $0x10] sm:$0xff]  ;;  %v164_v13 = vld [vmem:[%s619_s4 + $0x8] sm:$0xff]  ;;  %456 = vmatprep.subr.mxu0 %v500_v36  ;;  %vm501_vm2 = vmmov 0   ;;  %vm369_vm3 = vcmask 1043456  }
   0x9   :  { %v163_v14 = vld [vmem:[%s619_s4] sm:$0xff]  ;;  %v160_v33 = vld [vmem:[%s618_s3 + $0x8] sm:$0xff]  ;;  %v161_v34 = vld [vmem:[%s618_s3 + $0x10] sm:$0xff] }
   0xa   :  { %440 = vmatmul.mubr.msk.f32.gmra.mxu0 %vm57_vm0, %v32_v9  ;;  %v290_v15 = vld [vmem:[%s621_s6] sm:$0xf]  ;;  %v162_v35 = vld [vmem:[%s618_s3 + $0x18] sm:$0xff] }
   0xb   :  { %184 = vperm.xlu0 %471, %v166_v11   ;;  %v159_v16 = vld [vmem:[%s618_s3] sm:$0xff]  ;;  %464 = vmatprep.mubr.msk.f32.mxu0 %vm501_vm2, %v500_v36 }
   0xc   :  { %179 = vperm.xlu1 %472, %v165_v12   ;;  %450 = vmatprep.mubr.msk.f32.mxu1 %vm187_vm1, %v159_v16  ;;  %v289_v53 = vld [vmem:[%s620_s5] sm:$0xf]  ;;  %s502_s5 = smov [#allocation2]  }
   0xd   :  { %s396_s11 = sshll.u32 %s502_s5, 4  ;;  %s397_s11 = int_to_ptr.vmem [resolvable:$true] %s396_s11 }
   0xe   :  { %s477_s12 = scalar_lea.vmem %s397_s11, 64  ;;  %p482_p1 = scmp.lt.s32.totalorder %s397_s11, %s397_s11 }
   0xf   :  { %174 = vperm.xlu0 %471, %v164_v13   ;;  %p478_p0 = scmp.ne.s32.totalorder %s397_s11, %s477_s12  ;;  %p483_p2 = scmp.lt.s32.totalorder %s477_s12, %s477_s12 }
  0x10   :  { %169 = vperm.xlu1 %472, %v163_v14  }
  0x11   :  { %p484_p3 = por %p483_p2, %p482_p1 }
  0x13   :  { %293 = vperm.xlu0 %471, %v290_v15   ;;  %p485_p4 = pnand %p484_p3, %p478_p0 }
  0x7d   :  { %v55_v17 = vpop.permute.xlu0 %54 }
  0x7f   :  { %v45_v19 = vpop.permute.xlu1 %44 }
  0x82   :  { %v50_v23 = vpop.permute.xlu0 %49 }
  0x83   :  { %v40_v28 = vpop.permute.xlu1 %39 }
  0x86   :  { %v185_v37 = vpop.permute.xlu0 %184 }
  0x87   :  { %v180_v39 = vpop.permute.xlu1 %179 }
  0x8a   :  { %v175_v43 = vpop.permute.xlu0 %174 }
  0x8b   :  { %v170_v48 = vpop.permute.xlu1 %169 }
  0x8e   :  { %v294_v54 = vpop.permute.xlu0 %293 }
  0xc6   :  { %v438_v18 = vpop.f32.mrf.mxu0 }
  0xc7   :  { %v142_v25 = vadd.f32 %v438_v18, %v45_v19 }
  0xc8   :  { %v136_v20 = vpop.f32.mrf.mxu0 }
  0xc9   :  { %v137_v29 = vadd.f32 %v136_v20, %v40_v28  ;;  %v156_v31 = vmax.f32 %v142_v25, 0.0 }
  0xca   :  { %v441_v21 = vpop.f32.mrf.mxu0 }
  0xcb   :  { %v152_v22 = vadd.f32 %v441_v21, %v55_v17  ;;  %v155_v32 = vmax.f32 %v137_v29, 0.0 }
  0xcc   :  { %v146_v24 = vpop.f32.mrf.mxu0 }
  0xcd   :  { %v158_v26 = vmax.f32 %v152_v22, 0.0  ;;  %v147_v27 = vadd.f32 %v146_v24, %v50_v23 }
  0xcf   :  { %v157_v30 = vmax.f32 %v147_v27, 0.0  ;;  %442 = vmatprep.subr.mxu1 %v158_v26 }
  0xd0   :  { %443 = vmatpush3.msra.mxu1 %v158_v26 }
  0xd1   :  { %444 = vmatprep.subr.mxu1 %v157_v30 }
  0xd2   :  { %445 = vmatpush3.msra.mxu1 %v157_v30 }
  0xd3   :  { %446 = vmatprep.subr.mxu1 %v156_v31 }
  0xd4   :  { %447 = vmatpush3.msra.mxu1 %v156_v31 }
  0xd5   :  { %448 = vmatprep.subr.mxu1 %v155_v32 }
  0xd6   :  { %449 = vmatpush3.msra.mxu1 %v155_v32 }
  0xd7   :  { %451 = vmatmul.mubr.msk.f32.vlgmr.msra.gmra.mxu1 %vm187_vm1, %v160_v33 }
  0xd8   :  { %453 = vmatprep.mubr.msk.f32.mxu1 %vm187_vm1, %v161_v34 }
  0xdb   :  { %454 = vmatmul.mubr.msk.f32.gmra.mxu1 %vm187_vm1, %v162_v35 }
 0x197   :  { %v452_v38 = vpop.f32.mrf.mxu1 }
 0x198   :  { %v272_v45 = vadd.f32 %v452_v38, %v175_v43 }
 0x199   :  { %v266_v40 = vpop.f32.mrf.mxu1 }
 0x19a   :  { %v267_v49 = vadd.f32 %v266_v40, %v170_v48  ;;  %v286_v51 = vmax.f32 %v272_v45, 0.0 }
 0x19b   :  { %v455_v41 = vpop.f32.mrf.mxu1 }
 0x19c   :  { %v282_v42 = vadd.f32 %v455_v41, %v185_v37  ;;  %v285_v52 = vmax.f32 %v267_v49, 0.0 }
 0x19d   :  { %v276_v44 = vpop.f32.mrf.mxu1 }
 0x19e   :  { %v288_v46 = vmax.f32 %v282_v42, 0.0  ;;  %v277_v47 = vadd.f32 %v276_v44, %v180_v39 }
 0x1a0   :  { %v287_v50 = vmax.f32 %v277_v47, 0.0  ;;  %457 = vmatpush3.msra.mxu0 %v288_v46 }
 0x1a1   :  { %458 = vmatprep.subr.mxu0 %v500_v36 }
 0x1a2   :  { %459 = vmatpush3.msra.mxu0 %v287_v50 }
 0x1a3   :  { %460 = vmatprep.subr.mxu0 %v500_v36 }
 0x1a4   :  { %461 = vmatpush3.msra.mxu0 %v286_v51 }
 0x1a5   :  { %462 = vmatprep.subr.mxu0 %v500_v36 }
 0x1a6   :  { %463 = vmatpush3.msra.mxu0 %v285_v52 }
 0x1a7   :  { %465 = vmatmul.mubr.msk.f32.vlgmr.msra.gmra.mxu0 %vm187_vm1, %v289_v53 }
 0x267   :  { %v365_v55 = vpop.f32.mrf.mxu0 }
 0x268   :  { %v366_v56 = vadd.f32 %v365_v55, %v294_v54 }
 0x269   :  { %v466_v57 = vpop.f32.mrf.mxu0 }
 0x26a   :  { %v370_v58 = vsel %vm369_vm3, %v366_v56, -inf }
 0x26b   :  { %v371_v59 = vrot.slane %v370_v58, 4 }
 0x26d   :  { %v372_v60 = vmax.f32 %v370_v58, %v371_v59 }
 0x26f   :  { %v373_v61 = vrot.slane %v372_v60, 2 }
 0x271   :  { %v374_v62 = vmax.f32 %v372_v60, %v373_v61 }
 0x273   :  { %v375_v63 = vrot.slane %v374_v62, 1 }
 0x275   :  { %v376_v0 = vmax.f32 %v374_v62, %v375_v63 }
 0x277   :  { %v377_v1 = vsub.f32 %v366_v56, %v376_v0 }
 0x279   :  { %v378_v2 = vmul.f32 1.442695, %v377_v1 }
 0x27b   :  { %473 = vpow2.f32 %v378_v2 }
 0x288   :  { %v474_v3 = vpop.eup %473 }
 0x289   :  { %v380_v4 = vsel %vm369_vm3, %v474_v3, 0.0 }
 0x28a   :  { %v381_v5 = vrot.slane %v380_v4, 4 }
 0x28c   :  { %v382_v6 = vadd.f32 %v381_v5, %v380_v4 }
 0x28e   :  { %v383_v7 = vrot.slane %v382_v6, 2 }
 0x290   :  { %v384_v8 = vadd.f32 %v383_v7, %v382_v6 }
 0x292   :  { %v385_v9 = vrot.slane %v384_v8, 1 }
 0x294   :  { %v386_v10 = vadd.f32 %v385_v9, %v384_v8 }
 0x296   :  { %475 = vrcp.f32 %v386_v10 }
 0x2a3   :  { %v476_v11 = vpop.eup %475 }
 0x2a4   :  { %v388_v12 = vmul.f32 %v476_v11, %v474_v3 }
 0x2a6   :  { %389 = vst [vmem:[#allocation2] sm:$0xf] %v388_v12 }
 0x2a7   :  { %488 = shalt.err (!%p485_p4)
}
 0x2a8   :  { %399 = dma.vmem_to_hbm [thread:$0]  %s397_s11, 64, %s622_s7, [#allocation3]  }
 0x2a9   :  { %497 = dma.done.wait [#allocation3], 64  }
 0x2aa   :  { %498 = vsyncadd [#allocation3], 4294967232 }
 0x2ab   :  { %403 = vsyncpa [#allocation3], 1 }

</bundles_post_ra>
